<compile_context>
chip_gen: v5e
topology: v5e:2x2
jax: 0.10.0
libtpu: 0.0.40
codegen_flags: <defaults>
</compile_context>

<pallas_src>
import jax
import jax.numpy as jnp
from jax.experimental import pallas as pl
from jax.experimental.pallas import tpu as pltpu


def attention_kernel(x_ref, w_ref, b_ref, o_ref):
    # x_ref : (TB, S, H) batch tile in VMEM (native dtype — no upfront f32 copy)
    # w_ref : (1, H) Linear weight (torch layout) in VMEM
    # b_ref : (1, 1) Linear bias in SMEM (scalar path)
    # o_ref : (TB, H) pooled output tile
    x = x_ref[...]                                           # (TB, S, H)
    w = w_ref[...]                                           # (1, H)
    bias = b_ref[0, 0]                                       # scalar from SMEM

    # Linear(H -> 1) logits laid out (TB, S): multiply in the native dtype,
    # accumulate the lane-axis (H) reduction in f32.
    prod = x * w[None, :, :].astype(x.dtype)                 # (TB, S, H)
    scores = jnp.sum(prod, axis=-1, dtype=jnp.float32) + bias  # (TB, S)

    # Softmax over the sequence axis (dense lane reductions).  Exact division
    # keeps 1e-5 agreement (pl.reciprocal(approx=True) would loosen it).
    m = jnp.max(scores, axis=-1, keepdims=True)              # (TB, 1)
    e = jnp.exp(scores - m)                                   # (TB, S)
    p = e / jnp.sum(e, axis=-1, keepdims=True)                # (TB, S) f32

    # Weighted sum over S: native-dtype multiply, f32 accumulation -> (TB, H).
    pooled = jnp.sum(x * p.astype(x.dtype)[:, :, None], axis=1,
                     dtype=jnp.float32)                       # (TB, H)
    o_ref[...] = pooled.astype(o_ref.dtype)                   # one lane-dense store


def _vmem_plan(B, S, H, in_itemsize, out_itemsize):
    """Generation-aware batch-tile size (rows/step) and scoped-VMEM limit."""
    try:
        vmem_cap = int(pltpu.get_tpu_info().vmem_capacity_bytes)
    except Exception:
        vmem_cap = 64 << 20  # conservative fallback (v7x-sized VMEM)

    # v7x: 64 MiB VMEM per TC but 2 TensorCores/chip; v5e/v6e: 128 MiB, 1 TC.
    small_vmem_two_cores = vmem_cap <= (64 << 20)
    if small_vmem_two_cores:
        budget, base_limit, hard_cap = 12 << 20, 48 << 20, 56 << 20
    else:
        budget, base_limit, hard_cap = 32 << 20, 96 << 20, 100 << 20

    # Per-batch-row VMEM: double-buffered input tile + double-buffered output
    # tile + f32 intermediates the kernel materializes (x*w product before the
    # H-reduce, x*p product before the S-reduce: ~2 * S*H f32 per row).
    per_row = (2 * S * H * in_itemsize) + (2 * H * out_itemsize) + (2 * S * H * 4)

    if B < 8:
        tb = B  # block spans the full (tiny) batch dim — legal without 8-row alignment
    else:
        tb = max(8, (budget // per_row) // 8 * 8)
        b_ceil = -(-B // 8) * 8
        tb = min(tb, b_ceil)
        # Only force a split when the chip has 2 TensorCores: the "parallel"
        # batch axis then shards across both.  On 1-TC chips the extra step is
        # pure sequential overhead (~0.35 us) and a less roofline-efficient tile.
        if small_vmem_two_cores and tb >= b_ceil and B >= 16:
            tb = max(8, (-(-B // 2) + 7) // 8 * 8)
        # Prefer a nearby multiple-of-8 tile that divides B exactly (no ragged
        # last block) as long as it stays >= half the budget-sized tile.
        if B % tb != 0:
            lo = max(8, tb // 2)
            for cand in range(tb, lo - 1, -8):
                if B % cand == 0:
                    tb = cand
                    break

    # If even the minimum legal tile overshoots the budget (huge S*H rows),
    # raise the scoped-VMEM limit to cover it, capped near physical VMEM.
    # (For truly enormous S*H an S grid axis with online softmax would be the
    # next step; not needed at these shapes.)
    needed = per_row * tb + (2 << 20)          # +slack for weight tile / bias
    vmem_limit = int(min(hard_cap, max(base_limit, needed)))
    return tb, vmem_limit


def attention_module(lstm_outputs, weight, bias):
    """lstm_outputs: (B, S, H); weight: (1, H) torch layout; bias: (1, 1) -> (B, H)."""
    B, S, H = lstm_outputs.shape
    in_itemsize = lstm_outputs.dtype.itemsize
    out_dtype = lstm_outputs.dtype
    tb, vmem_limit = _vmem_plan(B, S, H, in_itemsize, jnp.dtype(out_dtype).itemsize)
    n_steps = pl.cdiv(B, tb)

    cost = pl.CostEstimate(
        flops=4 * B * S * H,
        transcendentals=B * S,
        bytes_accessed=(B * S * H * in_itemsize
                        + B * H * jnp.dtype(out_dtype).itemsize
                        + H * 4 + 4),
    )

    return pl.pallas_call(
        attention_kernel,
        out_shape=jax.ShapeDtypeStruct((B, H), out_dtype),
        grid_spec=pltpu.PrefetchScalarGridSpec(
            num_scalar_prefetch=0,
            grid=(n_steps,),
            in_specs=[
                pl.BlockSpec((tb, S, H), lambda b: (b, 0, 0)),       # batch tile
                pl.BlockSpec((1, H), lambda b: (0, 0)),              # shared weight
                pl.BlockSpec(memory_space=pltpu.MemorySpace.SMEM),   # bias scalar
            ],
            out_specs=pl.BlockSpec((tb, H), lambda b: (b, 0)),       # lane-dense 2-D out
        ),
        compiler_params=pltpu.CompilerParams(
            dimension_semantics=("parallel",),
            vmem_limit_bytes=vmem_limit,
        ),
        cost_estimate=cost,
    )(lstm_outputs, weight, bias)


def attention_reference(lstm_outputs, weight, bias):
    """Plain-JAX reference matching the PyTorch forward."""
    scores = jnp.einsum("bsh,oh->bso", lstm_outputs, weight) + bias[0, 0]  # (B, S, 1)
    scores = jax.nn.softmax(scores, axis=1)
    return jnp.sum(lstm_outputs * scores, axis=1)                          # (B, H)


if __name__ == "__main__":
    B, S, H = 2, 8, 32  # batch, seq, lstm_hidden_size

    key = jax.random.PRNGKey(0)
    k_x, k_w, k_b = jax.random.split(key, 3)

    lstm_outputs = jax.random.normal(k_x, (B, S, H), dtype=jnp.float32)
    # torch.nn.Linear(H, 1): weight (1, H), bias (1,) -> stored as (1, 1).
    bound = 1.0 / (H ** 0.5)
    weight = jax.random.uniform(k_w, (1, H), minval=-bound, maxval=bound,
                                dtype=jnp.float32)
    bias = jax.random.uniform(k_b, (1, 1), minval=-bound, maxval=bound,
                              dtype=jnp.float32)

    out = attention_module(lstm_outputs, weight, bias)
    out = jax.block_until_ready(out)

    ref = attention_reference(lstm_outputs, weight, bias)
    assert out.shape == (B, H), out.shape
    assert jnp.allclose(out, ref, atol=1e-5, rtol=1e-5), (
        f"max abs diff = {jnp.max(jnp.abs(out - ref))}"
    )

    print("KERNEL_OK")
</pallas_src>

<mosaic_0001>
module attributes {stable_mosaic.version = 11 : i64} {
  func.func @attention_kernel(%arg0: i32, %arg1: memref<2x8x32xf32, #tpu.memory_space<vmem>>, %arg2: memref<1x32xf32, #tpu.memory_space<vmem>>, %arg3: memref<1x1xf32, #tpu.memory_space<smem>>, %arg4: memref<2x32xf32, #tpu.memory_space<vmem>>) attributes {dimension_semantics = [#tpu.dimension_semantics<parallel>], iteration_bounds = array<i64: 1>, scalar_prefetch = 0 : i64, scratch_operands = 0 : i64, tpu.core_type = #tpu.core_type<tc>, window_params = [{transform_indices = @transform_0, window_bounds = array<i64: 2, 8, 32>}, {pipeline_mode = #tpu.pipeline_mode<synchronous>, transform_indices = @transform_1, window_bounds = array<i64: 1, 32>}, {transform_indices = @transform_2, window_bounds = array<i64: 1, 1>}, {transform_indices = @transform_3, window_bounds = array<i64: 2, 32>}]} {
    %c0 = arith.constant 0 : index
    %c0_0 = arith.constant 0 : index
    %c0_1 = arith.constant 0 : index
    %0 = vector.load %arg1[%c0, %c0_0, %c0_1] : memref<2x8x32xf32, #tpu.memory_space<vmem>>, vector<2x8x32xf32>
    %c0_2 = arith.constant 0 : index
    %c0_3 = arith.constant 0 : index
    %1 = vector.load %arg2[%c0_2, %c0_3] : memref<1x32xf32, #tpu.memory_space<vmem>>, vector<1x32xf32>
    %c0_4 = arith.constant 0 : index
    %c0_5 = arith.constant 0 : index
    %2 = memref.load %arg3[%c0_4, %c0_5] : memref<1x1xf32, #tpu.memory_space<smem>>
    %3 = vector.shape_cast %1 : vector<1x32xf32> to vector<1x1x32xf32>
    %4 = vector.broadcast %3 : vector<1x1x32xf32> to vector<2x8x32xf32>
    %5 = arith.mulf %0, %4 : vector<2x8x32xf32>
    %cst = arith.constant dense<0.000000e+00> : vector<2x8xf32>
    %6 = vector.multi_reduction <add>, %5, %cst [2] : vector<2x8x32xf32> to vector<2x8xf32>
    %7 = vector.broadcast %2 : f32 to vector<2x8xf32>
    %8 = arith.addf %6, %7 : vector<2x8xf32>
    %cst_6 = arith.constant dense<0xFF800000> : vector<2xf32>
    %9 = vector.multi_reduction <maximumf>, %8, %cst_6 [1] : vector<2x8xf32> to vector<2xf32>
    %10 = vector.shape_cast %9 : vector<2xf32> to vector<2x1xf32>
    %11 = vector.broadcast %10 : vector<2x1xf32> to vector<2x8xf32>
    %12 = arith.subf %8, %11 : vector<2x8xf32>
    %13 = math.exp %12 : vector<2x8xf32>
    %cst_7 = arith.constant dense<0.000000e+00> : vector<2xf32>
    %14 = vector.multi_reduction <add>, %13, %cst_7 [1] : vector<2x8xf32> to vector<2xf32>
    %15 = vector.shape_cast %14 : vector<2xf32> to vector<2x1xf32>
    %16 = vector.broadcast %15 : vector<2x1xf32> to vector<2x8xf32>
    %17 = arith.divf %13, %16 : vector<2x8xf32>
    %18 = vector.shape_cast %17 : vector<2x8xf32> to vector<2x8x1xf32>
    %19 = vector.broadcast %18 : vector<2x8x1xf32> to vector<2x8x32xf32>
    %20 = arith.mulf %0, %19 : vector<2x8x32xf32>
    %cst_8 = arith.constant dense<0.000000e+00> : vector<2x32xf32>
    %21 = vector.multi_reduction <add>, %20, %cst_8 [1] : vector<2x8x32xf32> to vector<2x32xf32>
    %c0_9 = arith.constant 0 : index
    %c0_10 = arith.constant 0 : index
    %22 = vector.load %arg4[%c0_9, %c0_10] : memref<2x32xf32, #tpu.memory_space<vmem>>, vector<2x32xf32>
    tpu.vector_store %arg4[%c0_9, %c0_10], %21 {strides = array<i32>} : memref<2x32xf32, #tpu.memory_space<vmem>>, vector<2x32xf32>,
    return
  }
  func.func @transform_0(%arg0: i32) -> (i32, i32, i32) {
    %c0_i32 = arith.constant 0 : i32
    %c0_i32_0 = arith.constant 0 : i32
    %c0_i32_1 = arith.constant 0 : i32
    return %arg0, %c0_i32, %c0_i32_0 : i32, i32, i32
  }
  func.func @transform_1(%arg0: i32) -> (i32, i32) {
    %c0_i32 = arith.constant 0 : i32
    %c0_i32_0 = arith.constant 0 : i32
    %c0_i32_1 = arith.constant 0 : i32
    return %c0_i32, %c0_i32_0 : i32, i32
  }
  func.func @transform_2(%arg0: i32) -> (i32, i32) {
    %c0_i32 = arith.constant 0 : i32
    %c0_i32_0 = arith.constant 0 : i32
    %c0_i32_1 = arith.constant 0 : i32
    return %c0_i32, %c0_i32_0 : i32, i32
  }
  func.func @transform_3(%arg0: i32) -> (i32, i32) {
    %c0_i32 = arith.constant 0 : i32
    %c0_i32_0 = arith.constant 0 : i32
    return %arg0, %c0_i32 : i32, i32
  }
}

</mosaic_0001>

<bundles_post_ra>
// kernel: tpu_custom_call.1
= control target key start
LH: loop header
LB: loop body
LE: loop exit
PB: predicated region body
PF: predicated region fallthrough
CT: control target
= control target key end

     0   :  { %9 = vsyncpa [#allocation4], 0  ;;  %s297_s0 = inlined_call_operand.hbm [shape: f32[2,8,32], index: 0, kind: input, shape index: {}]   ;;  %s298_s1 = inlined_call_operand.vmem [shape: f32[1,32], index: 1, kind: input, shape index: {}]   ;;  %s299_s2 = inlined_call_operand.<no memory space> [shape: f32[1,1], index: 2, kind: input, shape index: {}]   ;;  %s300_s3 = inlined_call_operand.hbm [shape: f32[2,32], index: 3, kind: output, shape index: {}]  }
   0x1   :  { %10 = vsyncpa [#allocation5], 0  ;;  %s15_s14 = sshll.u32 %s297_s0, 4  ;;  %s243_s15 = smov [#allocation3]   ;;  %s16_s14 = int_to_ptr.hbm [resolvable:$true] %s15_s14 }
   0x2   :  { %s17_s16 = sshll.u32 %s243_s15, 4  ;;  %s244_s17 = smov 128   ;;  %s18_s16 = int_to_ptr.vmem [resolvable:$true] %s17_s16 }
   0x3   :  { %s245_s18 = smov 8  }
   0x4   :  { %23 = dma.hbm_to_vmem [thread:$0]  %s16_s14, 256, %s18_s16, [#allocation4], %s244_s17, %s244_s17, %s245_s18  }
   0x5   :  { %239 = dma.done.wait [#allocation4], 256  }
   0x6   :  { %240 = vsyncadd [#allocation4], 4294967040  ;;  %v271_v0 = vld [vmem:[#allocation3] sm:$0xff]  ;;  %vm41_vm0 = vcmask 261120   ;;  %v277_v3 = vld [vmem:[#allocation3 + $0x8] sm:$0xff]  ;;  %v53_v8 = vlaneseq  ;;  %v48_v9 = vstv %s299_s2  ;;  %vm57_vm1 = vcmask 1041409  }
   0x7   :  { %v182_v1 = vld [vmem:[%s298_s1] ss:$0 sm:$0xff]  ;;  %vm60_vm2 = vcmask 58368   ;;  %v246_v18 = vmov 0   ;;  %s247_s1 = smov [#allocation6]   ;;  %s164_s24 = sshll.u32 %s300_s3, 4  ;;  %s165_s24 = int_to_ptr.hbm [resolvable:$true] %s164_s24 }
   0x8   :  { %v39_v2 = vmul.f32 %v182_v1, %v271_v0  ;;  %v40_v5 = vmul.f32 %v182_v1, %v277_v3  ;;  %v54_v10 = vand.u32 127, %v53_v8  ;;  %180 = vset.pattern.permute.xlu2 %v246_v18  ;;  %179 = vset.pattern.permute.xlu1 %v246_v18  ;;  %s162_s2 = sshll.u32 %s247_s1, 4  ;;  %vm155_vm11 = vcmask 254976   ;;  %s163_s2 = int_to_ptr.vmem [resolvable:$true] %s162_s2 }
   0x9   :  { %181 = vset.pattern.permute.xlu0 %v246_v18 }
   0xa   :  { %v42_v4 = vsel %vm41_vm0, %v39_v2, 0.0  ;;  %v45_v6 = vsel %vm41_vm0, %v40_v5, 0.0 }
   0xb   :  { %43 = vadd.xlane.f32.xlu0 %v42_v4 }
  0x13   :  { %46 = vadd.xlane.f32.xlu0 %v45_v6 }
  0x7e   :  { %v44_v7 = vpop.xlane.xlu0 %43 }
  0x7f   :  { %v49_v11 = vadd.f32 %v48_v9, %v44_v7 }
  0x81   :  { %v55_v14 = vperm.slane %v49_v11, %v54_v10 }
  0x86   :  { %v47_v12 = vpop.xlane.xlu0 %46 }
  0x87   :  { %v50_v13 = vadd.f32 %v48_v9, %v47_v12 }
  0x89   :  { %v56_v15 = vperm.slane %v50_v13, %v54_v10 }
  0x8b   :  { %v58_v16 = vsel %vm57_vm1, %v56_v15, %v55_v14 }
  0x8c   :  { %v61_v17 = vsel %vm60_vm2, %v58_v16, -inf }
  0x8d   :  { %62 = vmax.xlane.f32.xlu1 %v61_v17 }
 0x100   :  { %v63_v19 = vpop.xlane.xlu1 %62 }
 0x101   :  { %v65_v20 = vperm.slane %v63_v19, 0  ;;  %v66_v21 = vperm.slane %v63_v19, 1 }
 0x103   :  { %v69_v22 = vsub.f32 %v49_v11, %v65_v20  ;;  %v70_v23 = vsub.f32 %v50_v13, %v66_v21 }
 0x105   :  { %v71_v24 = vmul.f32 1.442695, %v69_v22  ;;  %v73_v25 = vmul.f32 1.442695, %v70_v23 }
 0x107   :  { %183 = vpow2.f32 %v71_v24 }
 0x108   :  { %185 = vpow2.f32 %v73_v25 }
 0x10d   :  { %v184_v26 = vpop.eup %183 }
 0x10e   :  { %v186_v27 = vpop.eup %185  ;;  %78 = vperm.xlu1 %179, %v184_v26  }
 0x10f   :  { %81 = vperm.xlu2 %180, %v186_v27  }
 0x169   :  { %v82_v28 = vpop.permute.xlu2 %81 }
 0x16a   :  { %v84_v30 = vperm.slane %v82_v28, %v54_v10 }
 0x180   :  { %v79_v29 = vpop.permute.xlu1 %78 }
 0x181   :  { %v83_v31 = vperm.slane %v79_v29, %v54_v10 }
 0x183   :  { %v85_v32 = vsel %vm57_vm1, %v84_v30, %v83_v31 }
 0x184   :  { %v87_v33 = vsel %vm60_vm2, %v85_v32, 0.0 }
 0x185   :  { %88 = vadd.xlane.f32.xlu2 %v87_v33 }
 0x1f8   :  { %v89_v34 = vpop.xlane.xlu2 %88 }
 0x1f9   :  { %v91_v35 = vperm.slane %v89_v34, 0  ;;  %v92_v36 = vperm.slane %v89_v34, 1 }
 0x1fb   :  { %187 = vrcp.f32 %v91_v35  ;;  %v106_v43 = vand.u32 2147483648, %v91_v35  ;;  %v121_v44 = vand.u32 2147483648, %v92_v36  ;;  %v104_v46 = vand.u32 2147483647, %v91_v35 }
 0x1fc   :  { %189 = vrcp.f32 %v92_v36  ;;  %v119_v48 = vand.u32 2147483647, %v92_v36  ;;  %vm100_vm5 = vweird.f32 %v91_v35  ;;  %vm115_vm6 = vweird.f32 %v92_v36 }
 0x1fd   :  { %v107_v51 = vor.u32 1.1754944e-38, %v106_v43  ;;  %v122_v52 = vor.u32 1.1754944e-38, %v121_v44  ;;  %vm105_vm9 = vcmp.eq.f32.partialorder %v104_v46, 8.507059e+37 }
 0x1fe   :  { %vm120_vm10 = vcmp.eq.f32.partialorder %v119_v48, 8.507059e+37 }
 0x201   :  { %v188_v37 = vpop.eup %187 }
 0x202   :  { %v190_v38 = vpop.eup %189  ;;  %v96_v39 = vmul.f32 %v188_v37, %v91_v35  ;;  %vm101_vm3 = vweird.f32 %v188_v37 }
 0x203   :  { %v111_v40 = vmul.f32 %v190_v38, %v92_v36  ;;  %vm116_vm4 = vweird.f32 %v190_v38  ;;  %vm102_vm7 = vmor %vm100_vm5, %vm101_vm3 }
 0x204   :  { %v97_v41 = vsub.f32 1.0, %v96_v39  ;;  %vm117_vm8 = vmor %vm115_vm6, %vm116_vm4 }
 0x205   :  { %v112_v42 = vsub.f32 1.0, %v111_v40 }
 0x206   :  { %v98_v45 = vmul.f32 %v188_v37, %v97_v41 }
 0x207   :  { %v113_v47 = vmul.f32 %v190_v38, %v112_v42 }
 0x208   :  { %v99_v49 = vadd.f32 %v188_v37, %v98_v45 }
 0x209   :  { %v114_v50 = vadd.f32 %v190_v38, %v113_v47 }
 0x20a   :  { %v103_v53 = vsel %vm102_vm7, %v188_v37, %v99_v49 }
 0x20b   :  { %v118_v54 = vsel %vm117_vm8, %v190_v38, %v114_v50  ;;  %v108_v55 = vsel %vm105_vm9, %v107_v51, %v103_v53 }
 0x20c   :  { %v123_v56 = vsel %vm120_vm10, %v122_v52, %v118_v54  ;;  %v109_v57 = vmul.f32 %v184_v26, %v108_v55 }
 0x20d   :  { %v124_v58 = vmul.f32 %v186_v27, %v123_v56 }
 0x20e   :  { %127 = vperm.xlu0 %181, %v109_v57  }
 0x20f   :  { %132 = vperm.xlu1 %179, %v124_v58  }
 0x280   :  { %v128_v59 = vpop.permute.xlu0 %127 }
 0x281   :  { %v133_v60 = vpop.permute.xlu1 %132  ;;  %v135_v61 = vmul.f32 %v128_v59, %v271_v0 }
 0x282   :  { %v136_v62 = vmul.f32 %v133_v60, %v277_v3 }
 0x283   :  { %v137_v63 = vsel %vm41_vm0, %v135_v61, 0.0 }
 0x284   :  { %v144_v1 = vsel %vm41_vm0, %v136_v62, 0.0  ;;  %v138_v2 = vrot.slane %v137_v63, 4 }
 0x285   :  { %v145_v4 = vrot.slane %v144_v1, 4 }
 0x286   :  { %v139_v5 = vadd.f32 %v138_v2, %v137_v63 }
 0x287   :  { %v146_v6 = vadd.f32 %v145_v4, %v144_v1 }
 0x288   :  { %v140_v7 = vrot.slane %v139_v5, 2 }
 0x289   :  { %v147_v8 = vrot.slane %v146_v6, 2 }
 0x28a   :  { %v141_v9 = vadd.f32 %v140_v7, %v139_v5 }
 0x28b   :  { %v148_v10 = vadd.f32 %v147_v8, %v146_v6 }
 0x28c   :  { %v142_v11 = vrot.slane %v141_v9, 1 }
 0x28d   :  { %v149_v12 = vrot.slane %v148_v10, 1 }
 0x28e   :  { %v143_v0 = vadd.f32 %v142_v11, %v141_v9 }
 0x28f   :  { %v150_v3 = vadd.f32 %v149_v12, %v148_v10 }
 0x291   :  { %v153_v13 = vsel %vm57_vm1, %v150_v3, %v143_v0 }
 0x292   :  { %156 = vst.msk [vmem:[#allocation6] sm:$0x3] %vm155_vm11, %v153_v13 }
 0x293   :  { %167 = dma.vmem_to_hbm [thread:$0]  %s163_s2, 32, %s165_s24, [#allocation5]  }
 0x294   :  { %241 = dma.done.wait [#allocation5], 32  }
 0x295   :  { %242 = vsyncadd [#allocation5], 4294967264 }
 0x296   :  { %172 = vsyncpa [#allocation4], 1 }
 0x297   :  { %173 = vsyncpa [#allocation5], 1 }

</bundles_post_ra>
